<compile_context>
chip_gen: v7x
topology: tpu7x:2x2x1
jax: 0.10.0
libtpu: 0.0.40
codegen_flags: <defaults>
</compile_context>

<pallas_src>
from functools import partial

import jax
import jax.numpy as jnp
import numpy as np
from jax.experimental import pallas as pl
from jax.experimental.pallas import tpu as pltpu


def _neural_attention_kernel(
    x_ref, mask_ref, wqkv_ref, bqkv_ref, wo_ref, bo_ref, o_ref,
    *, n_heads: int, head_size: int,
):
    bb, T, H = x_ref.shape                              # batch elements in this grid step
    x = x_ref[...].reshape(bb * T, H)                   # leading-dim merge: free relayout

    # Fused QKV projection: one (bb*T, H) x (H, 3H) MXU matmul + one bias add.
    qkv = jnp.dot(x, wqkv_ref[...], preferred_element_type=jnp.float32) + bqkv_ref[...]
    qkv = qkv.reshape(bb, T, 3 * H)                     # leading-dim split: free

    # Fold the 1/sqrt(hs) scale into Q once (B*T*H mults, not B*T*T*nh per-score mults).
    scale = jnp.float32(1.0 / (head_size ** 0.5))
    q_all = qkv[:, :, :H] * scale                       # (bb, T, H)

    # Additive mask bias computed once: 0 where attended, large finite negative otherwise
    # (finite => no NaN softmax even for fully-masked rows).
    bias = jnp.where(mask_ref[...] != 0, jnp.float32(0.0), jnp.float32(-1e30))  # (bb, T, T)

    head_outs = []
    for h in range(n_heads):                            # static loop; n_heads is small
        lo = h * head_size
        q_h = q_all[:, :, lo:lo + head_size]                         # (bb, T, hs)
        k_h = qkv[:, :, H + lo:H + lo + head_size]                   # (bb, T, hs)
        v_h = qkv[:, :, 2 * H + lo:2 * H + lo + head_size]           # (bb, T, hs)

        # Batched over the folded batch dim (known-good Mosaic einsum pattern).
        s = jnp.einsum("bqd,bkd->bqk", q_h, k_h,
                       preferred_element_type=jnp.float32) + bias    # (bb, T, T)

        m = jnp.max(s, axis=-1, keepdims=True)
        p = jnp.exp(s - m)
        denom = jnp.sum(p, axis=-1, keepdims=True)
        attn = p * pl.reciprocal(denom, approx=True)                 # EUP, not VALU divide

        head_outs.append(jnp.einsum("bqk,bkd->bqd", attn, v_h,
                                    preferred_element_type=jnp.float32))  # (bb, T, hs)

    out = jnp.concatenate(head_outs, axis=-1).reshape(bb * T, H)     # single lane concat

    # Output projection (weight pre-transposed to W_o.T = (H, H)): one full-K MXU pass.
    y = jnp.dot(out, wo_ref[...], preferred_element_type=jnp.float32) + bo_ref[...]
    o_ref[...] = y.astype(o_ref.dtype)


def neural_attention(x, attn_mask, params, *, n_heads: int, batch_blocks: int = 1):
    """x: (B, T, H) f32; attn_mask: (B, T, T) (nonzero == attend); params: PyTorch-layout weights.

    batch_blocks=1 folds the whole batch into one grid step (best for v5e/v6e, 1 TC/chip).
    On v7x (2 TCs) pass batch_blocks=2 to shard the batch across cores.
    """
    B, T, H = x.shape
    head_size = H // n_heads
    assert B % batch_blocks == 0
    bb = B // batch_blocks

    # Fuse + pre-transpose weights at trace time (one-time XLA work outside the kernel).
    wqkv = jnp.concatenate([params["wq"], params["wk"], params["wv"]], axis=0).T   # (H, 3H)
    bqkv = jnp.concatenate([params["bq"], params["bk"], params["bv"]]).reshape(1, 3 * H)
    wo_t = params["wo"].T                                                           # (H, H)
    bo = params["bo"].reshape(1, H)

    attn_mask = attn_mask.astype(jnp.int32)

    out_flat = pl.pallas_call(
        partial(_neural_attention_kernel, n_heads=n_heads, head_size=head_size),
        out_shape=jax.ShapeDtypeStruct((B * T, H), jnp.float32),
        grid=(batch_blocks,),
        in_specs=[
            pl.BlockSpec((bb, T, H), lambda i: (i, 0, 0)),    # x
            pl.BlockSpec((bb, T, T), lambda i: (i, 0, 0)),    # attn_mask
            pl.BlockSpec((H, 3 * H), lambda i: (0, 0)),       # fused W_qkv (pre-transposed)
            pl.BlockSpec((1, 3 * H), lambda i: (0, 0)),       # fused b_qkv
            pl.BlockSpec((H, H), lambda i: (0, 0)),           # W_o (pre-transposed)
            pl.BlockSpec((1, H), lambda i: (0, 0)),           # b_o
        ],
        out_specs=pl.BlockSpec((bb * T, H), lambda i: (i, 0)),
        compiler_params=pltpu.CompilerParams(
            dimension_semantics=("parallel",),
        ),
    )(x, attn_mask, wqkv, bqkv, wo_t, bo)

    return out_flat.reshape(B, T, H)


def _reference(x, attn_mask, params, *, n_heads: int):
    """Pure-JAX reference matching the PyTorch forward (eval mode)."""
    B, T, H = x.shape
    hs = H // n_heads

    def lin(x, w, b):
        return x @ w.T + b

    q = lin(x, params["wq"], params["bq"]).reshape(B, T, n_heads, hs).transpose(0, 2, 1, 3)
    k = lin(x, params["wk"], params["bk"]).reshape(B, T, n_heads, hs).transpose(0, 2, 1, 3)
    v = lin(x, params["wv"], params["bv"]).reshape(B, T, n_heads, hs).transpose(0, 2, 1, 3)

    mask = (attn_mask != 0)[:, None, :, :]                       # (B, 1, T, T)
    scores = jnp.einsum("bhqd,bhkd->bhqk", q, k) / jnp.sqrt(hs)
    scores = jnp.where(mask, scores, -jnp.inf)
    attn = jax.nn.softmax(scores, axis=-1)
    out = jnp.einsum("bhqk,bhkd->bhqd", attn, v)
    out = out.transpose(0, 2, 1, 3).reshape(B, T, H)
    return lin(out, params["wo"], params["bo"])


if __name__ == "__main__":
    # Small shapes consistent with the module: B=2, T=8, hidden=32, n_heads=4.
    B, T, H, n_heads = 2, 8, 32, 4

    key = jax.random.PRNGKey(0)
    ks = jax.random.split(key, 10)

    params = {
        "wq": 0.02 * jax.random.normal(ks[0], (H, H), jnp.float32),
        "bq": 0.02 * jax.random.normal(ks[1], (H,), jnp.float32),
        "wk": 0.02 * jax.random.normal(ks[2], (H, H), jnp.float32),
        "bk": 0.02 * jax.random.normal(ks[3], (H,), jnp.float32),
        "wv": 0.02 * jax.random.normal(ks[4], (H, H), jnp.float32),
        "bv": 0.02 * jax.random.normal(ks[5], (H,), jnp.float32),
        "wo": 0.02 * jax.random.normal(ks[6], (H, H), jnp.float32),
        "bo": 0.02 * jax.random.normal(ks[7], (H,), jnp.float32),
    }

    x = jax.random.normal(ks[8], (B, T, H), jnp.float32)

    # Padding-style mask: each row attends to a prefix of valid tokens (>=1 valid token
    # per row, so no fully-masked rows — matches typical ndt2 usage).
    valid_len = jnp.array([T, T - 3], dtype=jnp.int32)                      # per-batch valid length
    col = jnp.arange(T)[None, None, :]                                      # (1, 1, T)
    attn_mask = (col < valid_len[:, None, None]).astype(jnp.int32)          # (B, 1, T)
    attn_mask = jnp.broadcast_to(attn_mask, (B, T, T)).astype(jnp.int32)    # (B, T, T)

    out = neural_attention(x, attn_mask, params, n_heads=n_heads)
    out = jax.block_until_ready(out)

    ref = _reference(x, attn_mask, params, n_heads=n_heads)
    # Slightly relaxed tolerance: kernel uses EUP approximate reciprocal for the
    # softmax normalization.
    np.testing.assert_allclose(np.asarray(out), np.asarray(ref), rtol=1e-3, atol=1e-3)

    print("KERNEL_OK")
</pallas_src>

<mosaic_0001>
module attributes {stable_mosaic.version = 11 : i64} {
  func.func @_neural_attention_kernel(%arg0: i32, %arg1: memref<2x8x32xf32, #tpu.memory_space<vmem>>, %arg2: memref<2x8x8xi32, #tpu.memory_space<vmem>>, %arg3: memref<32x96xf32, #tpu.memory_space<vmem>>, %arg4: memref<1x96xf32, #tpu.memory_space<vmem>>, %arg5: memref<32x32xf32, #tpu.memory_space<vmem>>, %arg6: memref<1x32xf32, #tpu.memory_space<vmem>>, %arg7: memref<16x32xf32, #tpu.memory_space<vmem>>) attributes {dimension_semantics = [#tpu.dimension_semantics<parallel>], iteration_bounds = array<i64: 1>, scalar_prefetch = 0 : i64, scratch_operands = 0 : i64, tpu.core_type = #tpu.core_type<tc>, window_params = [{transform_indices = @transform_0, window_bounds = array<i64: 2, 8, 32>}, {transform_indices = @transform_1, window_bounds = array<i64: 2, 8, 8>}, {pipeline_mode = #tpu.pipeline_mode<synchronous>, transform_indices = @transform_2, window_bounds = array<i64: 32, 96>}, {pipeline_mode = #tpu.pipeline_mode<synchronous>, transform_indices = @transform_3, window_bounds = array<i64: 1, 96>}, {pipeline_mode = #tpu.pipeline_mode<synchronous>, transform_indices = @transform_4, window_bounds = array<i64: 32, 32>}, {pipeline_mode = #tpu.pipeline_mode<synchronous>, transform_indices = @transform_5, window_bounds = array<i64: 1, 32>}, {transform_indices = @transform_6, window_bounds = array<i64: 16, 32>}]} {
    %c0 = arith.constant 0 : index
    %c0_0 = arith.constant 0 : index
    %c0_1 = arith.constant 0 : index
    %0 = vector.load %arg1[%c0, %c0_0, %c0_1] : memref<2x8x32xf32, #tpu.memory_space<vmem>>, vector<2x8x32xf32>
    %1 = vector.shape_cast %0 : vector<2x8x32xf32> to vector<16x32xf32>
    %c0_2 = arith.constant 0 : index
    %c0_3 = arith.constant 0 : index
    %2 = vector.load %arg3[%c0_2, %c0_3] : memref<32x96xf32, #tpu.memory_space<vmem>>, vector<32x96xf32>
    %cst = arith.constant dense<0.000000e+00> : vector<16x96xf32>
    %3 = tpu.matmul %1, %2, %cst {dimension_numbers = #tpu.dot_dimension_numbers<[1], [0], [0], [1], [0, 0, 1, 1], [], []>} : vector<16x32xf32>, vector<32x96xf32>, vector<16x96xf32> -> vector<16x96xf32>
    %c0_4 = arith.constant 0 : index
    %c0_5 = arith.constant 0 : index
    %4 = vector.load %arg4[%c0_4, %c0_5] : memref<1x96xf32, #tpu.memory_space<vmem>>, vector<1x96xf32>
    %5 = vector.broadcast %4 : vector<1x96xf32> to vector<16x96xf32>
    %6 = arith.addf %3, %5 : vector<16x96xf32>
    %7 = vector.shape_cast %6 : vector<16x96xf32> to vector<2x8x96xf32>
    %8 = vector.extract_strided_slice %7 {offsets = [0, 0, 0], sizes = [2, 8, 32], strides = [1, 1, 1]} : vector<2x8x96xf32> to vector<2x8x32xf32>
    %cst_6 = arith.constant 0.353553385 : f32
    %9 = vector.broadcast %cst_6 : f32 to vector<2x8x32xf32>
    %10 = arith.mulf %8, %9 : vector<2x8x32xf32>
    %c0_7 = arith.constant 0 : index
    %c0_8 = arith.constant 0 : index
    %c0_9 = arith.constant 0 : index
    %11 = vector.load %arg2[%c0_7, %c0_8, %c0_9] : memref<2x8x8xi32, #tpu.memory_space<vmem>>, vector<2x8x8xi32>
    %c0_i32 = arith.constant 0 : i32
    %12 = vector.broadcast %c0_i32 : i32 to vector<2x8x8xi32>
    %13 = arith.cmpi ne, %11, %12 : vector<2x8x8xi32>
    %cst_10 = arith.constant 0.000000e+00 : f32
    %cst_11 = arith.constant -1.000000e+30 : f32
    %14 = vector.broadcast %cst_10 : f32 to vector<2x8x8xf32>
    %15 = vector.broadcast %cst_11 : f32 to vector<2x8x8xf32>
    %16 = arith.select %13, %14, %15 : vector<2x8x8xi1>, vector<2x8x8xf32>
    %17 = vector.extract_strided_slice %10 {offsets = [0, 0, 0], sizes = [2, 8, 8], strides = [1, 1, 1]} : vector<2x8x32xf32> to vector<2x8x8xf32>
    %18 = vector.extract_strided_slice %7 {offsets = [0, 0, 32], sizes = [2, 8, 8], strides = [1, 1, 1]} : vector<2x8x96xf32> to vector<2x8x8xf32>
    %19 = vector.extract_strided_slice %7 {offsets = [0, 0, 64], sizes = [2, 8, 8], strides = [1, 1, 1]} : vector<2x8x96xf32> to vector<2x8x8xf32>
    "tpu.trace_start"() <{level = 10 : i32, message = "bqd,bkd->bqk"}> : () -> ()
    %cst_12 = arith.constant dense<0.000000e+00> : vector<2x8x8xf32>
    %20 = tpu.matmul %17, %18, %cst_12 {dimension_numbers = #tpu.dot_dimension_numbers<[2], [2], [1], [1], [0, 0, 0, 1, 1, 1], [0], [0]>} : vector<2x8x8xf32>, vector<2x8x8xf32>, vector<2x8x8xf32> -> vector<2x8x8xf32>
    "tpu.trace_stop"() : () -> ()
    %21 = arith.addf %20, %16 : vector<2x8x8xf32>
    %cst_13 = arith.constant dense<0xFF800000> : vector<2x8xf32>
    %22 = vector.multi_reduction <maximumf>, %21, %cst_13 [2] : vector<2x8x8xf32> to vector<2x8xf32>
    %23 = vector.shape_cast %22 : vector<2x8xf32> to vector<2x8x1xf32>
    %24 = vector.broadcast %23 : vector<2x8x1xf32> to vector<2x8x8xf32>
    %25 = arith.subf %21, %24 : vector<2x8x8xf32>
    %26 = math.exp %25 : vector<2x8x8xf32>
    %cst_14 = arith.constant dense<0.000000e+00> : vector<2x8xf32>
    %27 = vector.multi_reduction <add>, %26, %cst_14 [2] : vector<2x8x8xf32> to vector<2x8xf32>
    %28 = vector.shape_cast %27 : vector<2x8xf32> to vector<2x8x1xf32>
    %29 = tpu.reciprocal %28 {approx = true} : vector<2x8x1xf32> -> vector<2x8x1xf32>
    %30 = vector.broadcast %29 : vector<2x8x1xf32> to vector<2x8x8xf32>
    %31 = arith.mulf %26, %30 : vector<2x8x8xf32>
    "tpu.trace_start"() <{level = 10 : i32, message = "bqk,bkd->bqd"}> : () -> ()
    %cst_15 = arith.constant dense<0.000000e+00> : vector<2x8x8xf32>
    %32 = tpu.matmul %31, %19, %cst_15 {dimension_numbers = #tpu.dot_dimension_numbers<[2], [1], [1], [2], [0, 0, 0, 1, 1, 2], [0], [0]>} : vector<2x8x8xf32>, vector<2x8x8xf32>, vector<2x8x8xf32> -> vector<2x8x8xf32>
    "tpu.trace_stop"() : () -> ()
    %33 = vector.extract_strided_slice %10 {offsets = [0, 0, 8], sizes = [2, 8, 8], strides = [1, 1, 1]} : vector<2x8x32xf32> to vector<2x8x8xf32>
    %34 = vector.extract_strided_slice %7 {offsets = [0, 0, 40], sizes = [2, 8, 8], strides = [1, 1, 1]} : vector<2x8x96xf32> to vector<2x8x8xf32>
    %35 = vector.extract_strided_slice %7 {offsets = [0, 0, 72], sizes = [2, 8, 8], strides = [1, 1, 1]} : vector<2x8x96xf32> to vector<2x8x8xf32>
    "tpu.trace_start"() <{level = 10 : i32, message = "bqd,bkd->bqk"}> : () -> ()
    %cst_16 = arith.constant dense<0.000000e+00> : vector<2x8x8xf32>
    %36 = tpu.matmul %33, %34, %cst_16 {dimension_numbers = #tpu.dot_dimension_numbers<[2], [2], [1], [1], [0, 0, 0, 1, 1, 1], [0], [0]>} : vector<2x8x8xf32>, vector<2x8x8xf32>, vector<2x8x8xf32> -> vector<2x8x8xf32>
    "tpu.trace_stop"() : () -> ()
    %37 = arith.addf %36, %16 : vector<2x8x8xf32>
    %cst_17 = arith.constant dense<0xFF800000> : vector<2x8xf32>
    %38 = vector.multi_reduction <maximumf>, %37, %cst_17 [2] : vector<2x8x8xf32> to vector<2x8xf32>
    %39 = vector.shape_cast %38 : vector<2x8xf32> to vector<2x8x1xf32>
    %40 = vector.broadcast %39 : vector<2x8x1xf32> to vector<2x8x8xf32>
    %41 = arith.subf %37, %40 : vector<2x8x8xf32>
    %42 = math.exp %41 : vector<2x8x8xf32>
    %cst_18 = arith.constant dense<0.000000e+00> : vector<2x8xf32>
    %43 = vector.multi_reduction <add>, %42, %cst_18 [2] : vector<2x8x8xf32> to vector<2x8xf32>
    %44 = vector.shape_cast %43 : vector<2x8xf32> to vector<2x8x1xf32>
    %45 = tpu.reciprocal %44 {approx = true} : vector<2x8x1xf32> -> vector<2x8x1xf32>
    %46 = vector.broadcast %45 : vector<2x8x1xf32> to vector<2x8x8xf32>
    %47 = arith.mulf %42, %46 : vector<2x8x8xf32>
    "tpu.trace_start"() <{level = 10 : i32, message = "bqk,bkd->bqd"}> : () -> ()
    %cst_19 = arith.constant dense<0.000000e+00> : vector<2x8x8xf32>
    %48 = tpu.matmul %47, %35, %cst_19 {dimension_numbers = #tpu.dot_dimension_numbers<[2], [1], [1], [2], [0, 0, 0, 1, 1, 2], [0], [0]>} : vector<2x8x8xf32>, vector<2x8x8xf32>, vector<2x8x8xf32> -> vector<2x8x8xf32>
    "tpu.trace_stop"() : () -> ()
    %49 = vector.extract_strided_slice %10 {offsets = [0, 0, 16], sizes = [2, 8, 8], strides = [1, 1, 1]} : vector<2x8x32xf32> to vector<2x8x8xf32>
    %50 = vector.extract_strided_slice %7 {offsets = [0, 0, 48], sizes = [2, 8, 8], strides = [1, 1, 1]} : vector<2x8x96xf32> to vector<2x8x8xf32>
    %51 = vector.extract_strided_slice %7 {offsets = [0, 0, 80], sizes = [2, 8, 8], strides = [1, 1, 1]} : vector<2x8x96xf32> to vector<2x8x8xf32>
    "tpu.trace_start"() <{level = 10 : i32, message = "bqd,bkd->bqk"}> : () -> ()
    %cst_20 = arith.constant dense<0.000000e+00> : vector<2x8x8xf32>
    %52 = tpu.matmul %49, %50, %cst_20 {dimension_numbers = #tpu.dot_dimension_numbers<[2], [2], [1], [1], [0, 0, 0, 1, 1, 1], [0], [0]>} : vector<2x8x8xf32>, vector<2x8x8xf32>, vector<2x8x8xf32> -> vector<2x8x8xf32>
    "tpu.trace_stop"() : () -> ()
    %53 = arith.addf %52, %16 : vector<2x8x8xf32>
    %cst_21 = arith.constant dense<0xFF800000> : vector<2x8xf32>
    %54 = vector.multi_reduction <maximumf>, %53, %cst_21 [2] : vector<2x8x8xf32> to vector<2x8xf32>
    %55 = vector.shape_cast %54 : vector<2x8xf32> to vector<2x8x1xf32>
    %56 = vector.broadcast %55 : vector<2x8x1xf32> to vector<2x8x8xf32>
    %57 = arith.subf %53, %56 : vector<2x8x8xf32>
    %58 = math.exp %57 : vector<2x8x8xf32>
    %cst_22 = arith.constant dense<0.000000e+00> : vector<2x8xf32>
    %59 = vector.multi_reduction <add>, %58, %cst_22 [2] : vector<2x8x8xf32> to vector<2x8xf32>
    %60 = vector.shape_cast %59 : vector<2x8xf32> to vector<2x8x1xf32>
    %61 = tpu.reciprocal %60 {approx = true} : vector<2x8x1xf32> -> vector<2x8x1xf32>
    %62 = vector.broadcast %61 : vector<2x8x1xf32> to vector<2x8x8xf32>
    %63 = arith.mulf %58, %62 : vector<2x8x8xf32>
    "tpu.trace_start"() <{level = 10 : i32, message = "bqk,bkd->bqd"}> : () -> ()
    %cst_23 = arith.constant dense<0.000000e+00> : vector<2x8x8xf32>
    %64 = tpu.matmul %63, %51, %cst_23 {dimension_numbers = #tpu.dot_dimension_numbers<[2], [1], [1], [2], [0, 0, 0, 1, 1, 2], [0], [0]>} : vector<2x8x8xf32>, vector<2x8x8xf32>, vector<2x8x8xf32> -> vector<2x8x8xf32>
    "tpu.trace_stop"() : () -> ()
    %65 = vector.extract_strided_slice %10 {offsets = [0, 0, 24], sizes = [2, 8, 8], strides = [1, 1, 1]} : vector<2x8x32xf32> to vector<2x8x8xf32>
    %66 = vector.extract_strided_slice %7 {offsets = [0, 0, 56], sizes = [2, 8, 8], strides = [1, 1, 1]} : vector<2x8x96xf32> to vector<2x8x8xf32>
    %67 = vector.extract_strided_slice %7 {offsets = [0, 0, 88], sizes = [2, 8, 8], strides = [1, 1, 1]} : vector<2x8x96xf32> to vector<2x8x8xf32>
    "tpu.trace_start"() <{level = 10 : i32, message = "bqd,bkd->bqk"}> : () -> ()
    %cst_24 = arith.constant dense<0.000000e+00> : vector<2x8x8xf32>
    %68 = tpu.matmul %65, %66, %cst_24 {dimension_numbers = #tpu.dot_dimension_numbers<[2], [2], [1], [1], [0, 0, 0, 1, 1, 1], [0], [0]>} : vector<2x8x8xf32>, vector<2x8x8xf32>, vector<2x8x8xf32> -> vector<2x8x8xf32>
    "tpu.trace_stop"() : () -> ()
    %69 = arith.addf %68, %16 : vector<2x8x8xf32>
    %cst_25 = arith.constant dense<0xFF800000> : vector<2x8xf32>
    %70 = vector.multi_reduction <maximumf>, %69, %cst_25 [2] : vector<2x8x8xf32> to vector<2x8xf32>
    %71 = vector.shape_cast %70 : vector<2x8xf32> to vector<2x8x1xf32>
    %72 = vector.broadcast %71 : vector<2x8x1xf32> to vector<2x8x8xf32>
    %73 = arith.subf %69, %72 : vector<2x8x8xf32>
    %74 = math.exp %73 : vector<2x8x8xf32>
    %cst_26 = arith.constant dense<0.000000e+00> : vector<2x8xf32>
    %75 = vector.multi_reduction <add>, %74, %cst_26 [2] : vector<2x8x8xf32> to vector<2x8xf32>
    %76 = vector.shape_cast %75 : vector<2x8xf32> to vector<2x8x1xf32>
    %77 = tpu.reciprocal %76 {approx = true} : vector<2x8x1xf32> -> vector<2x8x1xf32>
    %78 = vector.broadcast %77 : vector<2x8x1xf32> to vector<2x8x8xf32>
    %79 = arith.mulf %74, %78 : vector<2x8x8xf32>
    "tpu.trace_start"() <{level = 10 : i32, message = "bqk,bkd->bqd"}> : () -> ()
    %cst_27 = arith.constant dense<0.000000e+00> : vector<2x8x8xf32>
    %80 = tpu.matmul %79, %67, %cst_27 {dimension_numbers = #tpu.dot_dimension_numbers<[2], [1], [1], [2], [0, 0, 0, 1, 1, 2], [0], [0]>} : vector<2x8x8xf32>, vector<2x8x8xf32>, vector<2x8x8xf32> -> vector<2x8x8xf32>
    "tpu.trace_stop"() : () -> ()
    %81 = tpu.concatenate %32, %48, %64, %80 in 2 : vector<2x8x8xf32>, vector<2x8x8xf32>, vector<2x8x8xf32>, vector<2x8x8xf32> -> vector<2x8x32xf32>
    %82 = vector.shape_cast %81 : vector<2x8x32xf32> to vector<16x32xf32>
    %c0_28 = arith.constant 0 : index
    %c0_29 = arith.constant 0 : index
    %83 = vector.load %arg5[%c0_28, %c0_29] : memref<32x32xf32, #tpu.memory_space<vmem>>, vector<32x32xf32>
    %cst_30 = arith.constant dense<0.000000e+00> : vector<16x32xf32>
    %84 = tpu.matmul %82, %83, %cst_30 {dimension_numbers = #tpu.dot_dimension_numbers<[1], [0], [0], [1], [0, 0, 1, 1], [], []>} : vector<16x32xf32>, vector<32x32xf32>, vector<16x32xf32> -> vector<16x32xf32>
    %c0_31 = arith.constant 0 : index
    %c0_32 = arith.constant 0 : index
    %85 = vector.load %arg6[%c0_31, %c0_32] : memref<1x32xf32, #tpu.memory_space<vmem>>, vector<1x32xf32>
    %86 = vector.broadcast %85 : vector<1x32xf32> to vector<16x32xf32>
    %87 = arith.addf %84, %86 : vector<16x32xf32>
    %c0_33 = arith.constant 0 : index
    %c0_34 = arith.constant 0 : index
    %88 = vector.load %arg7[%c0_33, %c0_34] : memref<16x32xf32, #tpu.memory_space<vmem>>, vector<16x32xf32>
    tpu.vector_store %arg7[%c0_33, %c0_34], %87 {strides = array<i32>} : memref<16x32xf32, #tpu.memory_space<vmem>>, vector<16x32xf32>,
    return
  }
  func.func @transform_0(%arg0: i32) -> (i32, i32, i32) {
    %c0_i32 = arith.constant 0 : i32
    %c0_i32_0 = arith.constant 0 : i32
    %c0_i32_1 = arith.constant 0 : i32
    return %arg0, %c0_i32, %c0_i32_0 : i32, i32, i32
  }
  func.func @transform_1(%arg0: i32) -> (i32, i32, i32) {
    %c0_i32 = arith.constant 0 : i32
    %c0_i32_0 = arith.constant 0 : i32
    %c0_i32_1 = arith.constant 0 : i32
    return %arg0, %c0_i32, %c0_i32_0 : i32, i32, i32
  }
  func.func @transform_2(%arg0: i32) -> (i32, i32) {
    %c0_i32 = arith.constant 0 : i32
    %c0_i32_0 = arith.constant 0 : i32
    %c0_i32_1 = arith.constant 0 : i32
    return %c0_i32, %c0_i32_0 : i32, i32
  }
  func.func @transform_3(%arg0: i32) -> (i32, i32) {
    %c0_i32 = arith.constant 0 : i32
    %c0_i32_0 = arith.constant 0 : i32
    %c0_i32_1 = arith.constant 0 : i32
    return %c0_i32, %c0_i32_0 : i32, i32
  }
  func.func @transform_4(%arg0: i32) -> (i32, i32) {
    %c0_i32 = arith.constant 0 : i32
    %c0_i32_0 = arith.constant 0 : i32
    %c0_i32_1 = arith.constant 0 : i32
    return %c0_i32, %c0_i32_0 : i32, i32
  }
  func.func @transform_5(%arg0: i32) -> (i32, i32) {
    %c0_i32 = arith.constant 0 : i32
    %c0_i32_0 = arith.constant 0 : i32
    %c0_i32_1 = arith.constant 0 : i32
    return %c0_i32, %c0_i32_0 : i32, i32
  }
  func.func @transform_6(%arg0: i32) -> (i32, i32) {
    %c0_i32 = arith.constant 0 : i32
    %c0_i32_0 = arith.constant 0 : i32
    return %arg0, %c0_i32 : i32, i32
  }
}

</mosaic_0001>

<bundles_post_ra>
// kernel: tpu_custom_call.1
= control target key start
LH: loop header
LB: loop body
LE: loop exit
PB: predicated region body
PF: predicated region fallthrough
CT: control target
= control target key end

     0   :  { %11 = vsyncpa [#allocation3], 0  ;;  %s2322_s0 = inlined_call_operand.hbm [shape: f32[2,8,32], index: 0, kind: input, shape index: {}]   ;;  %s2323_s1 = inlined_call_operand.hbm [shape: s32[2,8,8], index: 1, kind: input, shape index: {}]   ;;  %s2324_s2 = inlined_call_operand.hbm [shape: f32[32,96], index: 2, kind: input, shape index: {}]   ;;  %s2325_s3 = inlined_call_operand.vmem [shape: f32[1,96], index: 3, kind: input, shape index: {}]   ;;  %s2326_s4 = inlined_call_operand.hbm [shape: f32[32,32], index: 4, kind: input, shape index: {}]   ;;  %s2327_s5 = inlined_call_operand.vmem [shape: f32[1,32], index: 5, kind: input, shape index: {}]   ;;  %s2328_s6 = inlined_call_operand.hbm [shape: f32[16,32], index: 6, kind: output, shape index: {}]  }
   0x1   :  { %12 = vsyncpa [#allocation6], 0 }
   0x2   :  { %13 = vsyncpa [#allocation9], 0 }
   0x3   :  { %14 = vsyncpa [#allocation4], 0  ;;  %s2013_s21 = smov [#allocation5]   ;;  %s2014_s23 = smov [#allocation2]  }
   0x4   :  { %s32_s22 = sshll.u32 %s2013_s21, 4  ;;  %s20_s24 = sshll.u32 %s2014_s23, 4  ;;  %s33_s22 = int_to_ptr.vmem [resolvable:$true] %s32_s22  ;;  %s2071_s24 = int_to_ptr.vmem [resolvable:$true] %s20_s24 }
   0x5   :  { %s1895_s27 = scalar_lea.hbm %s2323_s1, 256 }
   0x6   :  { %p1896_p0 = scmp.ne.s32.totalorder %s2323_s1, %s1895_s27  ;;  %p1899_p1 = scmp.lt.u32.totalorder %s1895_s27, %s2323_s1 }
   0x8   :  { %p1901_p2 = pnand %p1899_p1, %p1896_p0 }
   0xa   :  { %1904 = shalt.err (!%p1901_p2)
}
   0xb   :  { %s1905_s8 = scalar_lea.vmem %s33_s22, 256  ;;  %p1910_p4 = scmp.lt.s32.totalorder %s33_s22, %s33_s22 }
   0xc   :  { %p1906_p3 = scmp.ne.s32.totalorder %s33_s22, %s1905_s8  ;;  %p1911_p5 = scmp.lt.s32.totalorder %s1905_s8, %s1905_s8 }
   0xe   :  { %p1912_p6 = por %p1911_p5, %p1910_p4 }
  0x10   :  { %p1913_p7 = pnand %p1912_p6, %p1906_p3 }
  0x12   :  { %1916 = shalt.err (!%p1913_p7)
}
  0x13   :  { %s2015_s9 = smov 128   ;;  %s2016_s10 = smov 8  }
  0x14   :  { %38 = dma.hbm_to_vmem [thread:$0]  %s2323_s1, 256, %s33_s22, [#allocation6], %s2015_s9, %s2015_s9, %s2016_s10  }
  0x15   :  { %s1917_s15 = scalar_lea.hbm %s2322_s0, 256 }
  0x16   :  { %p1918_p8 = scmp.ne.s32.totalorder %s2322_s0, %s1917_s15  ;;  %p1921_p9 = scmp.lt.u32.totalorder %s1917_s15, %s2322_s0 }
  0x18   :  { %p1923_p10 = pnand %p1921_p9, %p1918_p8 }
  0x1a   :  { %1926 = shalt.err (!%p1923_p10)
}
  0x1b   :  { %s1927_s20 = scalar_lea.vmem %s2071_s24, 256  ;;  %p1932_p12 = scmp.lt.s32.totalorder %s2071_s24, %s2071_s24 }
  0x1c   :  { %p1928_p11 = scmp.ne.s32.totalorder %s2071_s24, %s1927_s20  ;;  %p1933_p13 = scmp.lt.s32.totalorder %s1927_s20, %s1927_s20 }
  0x1e   :  { %p1934_p0 = por %p1933_p13, %p1932_p12 }
  0x20   :  { %p1935_p1 = pnand %p1934_p0, %p1928_p11 }
  0x22   :  { %1938 = shalt.err (!%p1935_p1)
}
  0x23   :  { %26 = dma.hbm_to_vmem [thread:$0]  %s2322_s0, 256, %s2071_s24, [#allocation3], %s2015_s9, %s2015_s9, %s2016_s10  }
  0x24   :  { %s2017_s22 = smov [#allocation7]   ;;  %s2018_s25 = smov [#allocation8]  }
  0x25   :  { %s44_s23 = sshll.u32 %s2017_s22, 4  ;;  %s58_s26 = sshll.u32 %s2018_s25, 4  ;;  %s45_s23 = int_to_ptr.vmem [resolvable:$true] %s44_s23  ;;  %s2108_s26 = int_to_ptr.vmem [resolvable:$true] %s58_s26 }
  0x26   :  { %s1939_s29 = scalar_lea.hbm %s2324_s2, 512 }
  0x27   :  { %p1940_p2 = scmp.ne.s32.totalorder %s2324_s2, %s1939_s29  ;;  %p1943_p3 = scmp.lt.u32.totalorder %s1939_s29, %s2324_s2 }
  0x29   :  { %p1945_p4 = pnand %p1943_p3, %p1940_p2 }
  0x2b   :  { %1948 = shalt.err (!%p1945_p4)
}
  0x2c   :  { %s1949_s0 = scalar_lea.vmem %s45_s23, 512  ;;  %p1954_p6 = scmp.lt.s32.totalorder %s45_s23, %s45_s23 }
  0x2d   :  { %p1950_p5 = scmp.ne.s32.totalorder %s45_s23, %s1949_s0  ;;  %p1955_p7 = scmp.lt.s32.totalorder %s1949_s0, %s1949_s0 }
  0x2f   :  { %p1956_p8 = por %p1955_p7, %p1954_p6 }
  0x31   :  { %p1957_p9 = pnand %p1956_p8, %p1950_p5 }
  0x33   :  { %1960 = shalt.err (!%p1957_p9)
}
  0x34   :  { %50 = dma.hbm_to_vmem [thread:$0]  %s2324_s2, 512, %s45_s23, [#allocation6], %s2015_s9, %s2015_s9, %s2016_s10  }
  0x35   :  { %s1961_s15 = scalar_lea.hbm %s2326_s4, 512 }
  0x36   :  { %p1962_p10 = scmp.ne.s32.totalorder %s2326_s4, %s1961_s15  ;;  %p1965_p11 = scmp.lt.u32.totalorder %s1961_s15, %s2326_s4 }
  0x38   :  { %p1967_p12 = pnand %p1965_p11, %p1962_p10 }
  0x3a   :  { %1970 = shalt.err (!%p1967_p12)
}
  0x3b   :  { %s1971_s20 = scalar_lea.vmem %s2108_s26, 512  ;;  %p1976_p0 = scmp.lt.s32.totalorder %s2108_s26, %s2108_s26 }
  0x3c   :  { %p1972_p13 = scmp.ne.s32.totalorder %s2108_s26, %s1971_s20  ;;  %p1977_p1 = scmp.lt.s32.totalorder %s1971_s20, %s1971_s20 }
  0x3e   :  { %p1978_p2 = por %p1977_p1, %p1976_p0 }
  0x40   :  { %p1979_p3 = pnand %p1978_p2, %p1972_p13 }
  0x42   :  { %1982 = shalt.err (!%p1979_p3)
}
  0x43   :  { %64 = dma.hbm_to_vmem [thread:$0]  %s2326_s4, 512, %s2108_s26, [#allocation9], %s2015_s9, %s2015_s9, %s2016_s10  }
  0x44   :  { %2005 = dma.done.wait [#allocation3], 256  }
  0x45   :  { %2006 = vsyncadd [#allocation3], 4294967040 }
  0x46   :  { %2007 = dma.done.wait [#allocation6], 768  }
  0x47   :  { %2008 = vsyncadd [#allocation6], 4294966528 }
  0x48   :  { %2009 = dma.done.wait [#allocation9], 512  }
  0x49   :  { %2010 = vsyncadd [#allocation9], 4294966784  ;;  %vm92_vm0 = vcmask 261120   ;;  %v81_v0 = vld [vmem:[#allocation7] sm:$0xff]  ;;  %v82_v1 = vld [vmem:[#allocation7 + $0x8] sm:$0xff]  ;;  %v2019_v8 = vmov 0.0  }
  0x4a   :  { %v83_v2 = vld [vmem:[#allocation7 + $0x10] sm:$0xff]  ;;  %v1824_v3 = vpack.c.bf16 %v82_v1, %v81_v0  ;;  %v84_v4 = vld [vmem:[#allocation7 + $0x18] sm:$0xff]  ;;  %v79_v5 = vld [vmem:[#allocation2] sm:$0xff]  ;;  %1733 = vmatprep.subr.mxu1 %v2019_v8  ;;  %vm2020_vm1 = vmmov 0   ;;  %s2021_s22 = smov 96   ;;  %vm185_vm2 = vcmask 64512  }
  0x4b   :  { %v1828_v6 = vpack.c.bf16 %v84_v4, %v83_v2  ;;  %1730 = vmatprep.mubr.msk.f32.mxu0 %vm92_vm0, %v79_v5  ;;  %v80_v7 = vld [vmem:[#allocation2 + $0x8] sm:$0xff]  ;;  %1735 = vmatprep.mubr.msk.f32.mxu1 %vm2020_vm1, %v2019_v8  ;;  %v1648_v9 = vld [vmem:[%s2325_s3] ss:$0 sm:$0xff]  ;;  %v176_v18 = vld [vmem:[#allocation5] sm:$0xff]  ;;  %v2022_v20 = vmov -1e+30  }
  0x4c   :  { %1825 = vmatprep.subr.bf16.mxu0 %v1824_v3  ;;  %vm178_vm3 = vcmp.ne.s32.totalorder %v176_v18, 0  ;;  %v177_v19 = vld [vmem:[#allocation5 + $0x8] sm:$0xff]  ;;  %s2023_s3 = smov 64   ;;  %s2024_s23 = smov 88   ;;  %vm1532_vm5 = vcmask 195584   ;;  %vm1529_vm6 = vcmask 130048  }
  0x4d   :  { %1827 = vmatpush3.bf16.msra.mxu0 %v1824_v3  ;;  %v2180_v21 = vsel %vm178_vm3, 0.0, %v2022_v20  ;;  %vm179_vm4 = vcmp.ne.s32.totalorder %v177_v19, 0  ;;  %s2025_s25 = smov 120   ;;  %s2026_s26 = smov 56  }
  0x4e   :  { %1829 = vmatprep.subr.bf16.mxu0 %v1828_v6  ;;  %v2183_v25 = vsel %vm179_vm4, 0.0, %v2022_v20  ;;  %s2027_s27 = smov 112   ;;  %s2028_s28 = smov 80  }
  0x4f   :  { %s2029_s29 = smov 48   ;;  %s2030_s30 = smov 72  }
  0x50   :  { %s2031_s7 = smov 104   ;;  %s2032_s8 = smov 40  }
  0x51   :  { %1831 = vmatpush3.bf16.msra.mxu0 %v1828_v6  ;;  %s2033_s11 = smov 16   ;;  %s2034_s0 = smov 24  }
  0x52   :  { %1753 = vmatprep.subr.mxu0 %v2019_v8  ;;  %s2035_s13 = smov [#allocation10]  }
  0x53   :  { %s1634_s14 = sshll.u32 %s2035_s13, 4  ;;  %s1635_s14 = int_to_ptr.vmem [resolvable:$true] %s1634_s14 }
  0x54   :  { %1731 = vmatmul.mubr.msk.f32.vlgmr.msra.gmra.mrb[0].mxu0 %vm92_vm0, %v80_v7  ;;  %s1983_s15 = scalar_lea.vmem %s1635_s14, 256  ;;  %p1988_p5 = scmp.lt.s32.totalorder %s1635_s14, %s1635_s14 }
  0x55   :  { %1755 = vmatprep.mubr.msk.f32.mxu0 %vm2020_vm1, %v2019_v8  ;;  %p1984_p4 = scmp.ne.s32.totalorder %s1635_s14, %s1983_s15  ;;  %p1989_p6 = scmp.lt.s32.totalorder %s1983_s15, %s1983_s15 }
  0x57   :  { %p1990_p7 = por %p1989_p6, %p1988_p5 }
  0x59   :  { %p1991_p8 = pnand %p1990_p7, %p1984_p4 }
 0x127   :  { %v1732_v10 = vpop.f32.mrb[0].mxu0 }
 0x128   :  { %v165_v11 = vpop.f32.mrb[1].mxu0  ;;  %v2159_v13 = vadd.f32 %v1732_v10, %v1648_v9 }
 0x129   :  { %v2156_v12 = vadd.f32 %v1648_v9, %v165_v11 }
 0x12a   :  { %v2173_v17 = vmul.f32 0.35355338, %v2159_v13 }
 0x12b   :  { %183 = vrot.lane.b32.xlu0 %v2156_v12, %s2021_s22  ;;  %v2165_v15 = vmul.f32 0.35355338, %v2156_v12 }
 0x12f   :  { %262 = vrot.lane.b32.xlu0 %v2159_v13, %s2021_s22 }
 0x19d   :  { %v184_v14 = vpop.permute.xlu0 %183 }
 0x19e   :  { %1734 = vmatpush3.xpose.msk.msra.mxu1 %vm185_vm2, %v184_v14 }
 0x19f   :  { %1738 = vmatprep.subr.mxu1 %v2019_v8 }
 0x1a1   :  { %v263_v16 = vpop.permute.xlu0 %262  ;;  %1736 = vmatmul.mubr.msk.f32.vlgmr.msra.gmra.mrb[0].mxu1 %vm185_vm2, %v2165_v15 }
 0x1a2   :  { %1739 = vmatpush3.xpose.msk.msra.mxu1 %vm185_vm2, %v263_v16  ;;  %1740 = vmatprep.mubr.msk.f32.mxu1 %vm2020_vm1, %v2019_v8 }
 0x1a3   :  { %1743 = vmatprep.subr.mxu1 %v2019_v8 }
 0x1a5   :  { %1741 = vmatmul.mubr.msk.f32.vlgmr.msra.gmra.mrb[2].mxu1 %vm185_vm2, %v2173_v17 }
 0x1a6   :  { %1745 = vmatprep.mubr.msk.f32.mxu1 %vm2020_vm1, %v2019_v8 }
 0x274   :  { %v257_v22 = vpop.f32.mrb[0].mxu1 }
 0x275   :  { %v258_v23 = vadd.f32 %v257_v22, %v2180_v21  ;;  %v1737_v24 = vpop.f32.mrb[1].mxu1 }
 0x277   :  { %v339_v26 = vsel %vm185_vm2, %v258_v23, -inf }
 0x278   :  { %340 = vmax.xlane.f32.xlu1 %v339_v26  ;;  %v335_v27 = vpop.f32.mrb[2].mxu1 }
 0x279   :  { %v336_v28 = vadd.f32 %v335_v27, %v2183_v25  ;;  %v1742_v29 = vpop.f32.mrb[3].mxu1 }
 0x27b   :  { %v342_v30 = vsel %vm185_vm2, %v336_v28, -inf }
 0x27c   :  { %343 = vmax.xlane.f32.xlu1 %v342_v30 }
 0x28d   :  { %361 = vrot.lane.b32.xlu1 %v2156_v12, %s2023_s3 }
 0x291   :  { %437 = vrot.lane.b32.xlu1 %v2159_v13, %s2023_s3 }
 0x295   :  { %515 = vrot.lane.b32.xlu1 %v2156_v12, %s2024_s23 }
 0x299   :  { %593 = vrot.lane.b32.xlu1 %v2159_v13, %s2024_s23 }
 0x305   :  { %v341_v31 = vpop.xlane.xlu1 %340 }
 0x306   :  { %v345_v32 = vsub.f32 %v258_v23, %v341_v31 }
 0x308   :  { %v347_v33 = vmul.f32 1.442695, %v345_v32 }
 0x309   :  { %v344_v34 = vpop.xlane.xlu1 %343 }
 0x30a   :  { %1863 = vpow2.f32 %v347_v33  ;;  %v346_v35 = vsub.f32 %v336_v28, %v344_v34 }
 0x30c   :  { %v349_v36 = vmul.f32 1.442695, %v346_v35 }
 0x30d   :  { %v362_v37 = vpop.permute.xlu1 %361 }
 0x30e   :  { %1865 = vpow2.f32 %v349_v36  ;;  %1744 = vmatpush3.msra.mxu1 %v362_v37 }
 0x30f   :  { %1748 = vmatprep.subr.mxu1 %v2019_v8 }
 0x311   :  { %v438_v38 = vpop.permute.xlu1 %437 }
 0x314   :  { %v1864_v39 = vpop.eup %1863 }
 0x315   :  { %v516_v40 = vpop.permute.xlu1 %515  ;;  %v351_v41 = vsel %vm185_vm2, %v1864_v39, 0.0 }
 0x316   :  { %352 = vadd.xlane.f32.xlu0 %v351_v41  ;;  %1754 = vmatpush3.xpose.msk.msra.mxu0 %vm185_vm2, %v516_v40 }
 0x317   :  { %1763 = vmatprep.subr.mxu0 %v2019_v8 }
 0x318   :  { %v1866_v42 = vpop.eup %1865 }
 0x319   :  { %v354_v43 = vsel %vm185_vm2, %v1866_v42, 0.0  ;;  %v594_v44 = vpop.permute.xlu1 %593 }
 0x31a   :  { %355 = vadd.xlane.f32.xlu1 %v354_v43 }
 0x32b   :  { %591 = vrot.lane.b32.xlu1 %v2173_v17, %s2025_s25 }
 0x32c   :  { %513 = vrot.lane.b32.xlu0 %v2165_v15, %s2025_s25 }
 0x3a3   :  { %v353_v45 = vpop.xlane.xlu0 %352 }
 0x3a4   :  { %1867 = vrcp.f32 %v353_v45 }
 0x3a7   :  { %v514_v46 = vpop.permute.xlu0 %513  ;;  %v356_v47 = vpop.xlane.xlu1 %355 }
 0x3a8   :  { %1869 = vrcp.f32 %v356_v47  ;;  %1756 = vmatmul.mubr.msk.f32.vlgmr.msra.gmra.mrb[2].mxu0 %vm185_vm2, %v514_v46 }
 0x3a9   :  { %1765 = vmatprep.mubr.msk.f32.mxu0 %vm2020_vm1, %v2019_v8 }
 0x3ab   :  { %v592_v52 = vpop.permute.xlu1 %591 }
 0x3ae   :  { %v1868_v48 = vpop.eup %1867 }
 0x3af   :  { %v359_v49 = vmul.f32 %v1868_v48, %v1864_v39 }
 0x3b1   :  { %1746 = vmatmul.mubr.msk.f32.vlgmr.msra.gmra.mrb[4].mxu1 %vm185_vm2, %v359_v49 }
 0x3b2   :  { %v1870_v50 = vpop.eup %1869  ;;  %1749 = vmatpush3.msra.mxu1 %v438_v38  ;;  %1750 = vmatprep.mubr.msk.f32.mxu1 %vm2020_vm1, %v2019_v8 }
 0x3b3   :  { %v360_v51 = vmul.f32 %v1870_v50, %v1866_v42  ;;  %1758 = vmatprep.subr.mxu1 %v2019_v8 }
 0x3b5   :  { %1751 = vmatmul.mubr.msk.f32.vlgmr.msra.gmra.mrb[6].mxu1 %vm185_vm2, %v360_v51 }
 0x3b6   :  { %1760 = vmatprep.mubr.msk.f32.mxu1 %vm2020_vm1, %v2019_v8 }
 0x3b9   :  { %1759 = vmatpush3.xpose.msk.msra.mxu1 %vm185_vm2, %v594_v44 }
 0x3ba   :  { %1768 = vmatprep.subr.mxu1 %v2019_v8 }
 0x3bc   :  { %1761 = vmatmul.mubr.msk.f32.vlgmr.msra.gmra.mrb[8].mxu1 %vm185_vm2, %v592_v52 }
 0x3bd   :  { %1770 = vmatprep.mubr.msk.f32.mxu1 %vm2020_vm1, %v2019_v8 }
 0x47b   :  { %v587_v53 = vpop.f32.mrb[2].mxu0 }
 0x47c   :  { %v588_v54 = vadd.f32 %v587_v53, %v2180_v21  ;;  %v1757_v55 = vpop.f32.mrb[3].mxu0 }
 0x47e   :  { %v669_v56 = vsel %vm185_vm2, %v588_v54, -inf }
 0x47f   :  { %670 = vmax.xlane.f32.xlu1 %v669_v56 }
 0x484   :  { %v2216_v57 = vpop.f32.mrb[4].mxu1 }
 0x485   :  { %v1747_v58 = vpop.f32.mrb[5].mxu1 }
 0x488   :  { %v2218_v59 = vpop.f32.mrb[6].mxu1 }
 0x489   :  { %v1752_v60 = vpop.f32.mrb[7].mxu1 }
 0x48f   :  { %v665_v61 = vpop.f32.mrb[8].mxu1 }
 0x490   :  { %v666_v62 = vadd.f32 %v665_v61, %v2183_v25  ;;  %v1762_v63 = vpop.f32.mrb[9].mxu1 }
 0x492   :  { %v672_v0 = vsel %vm185_vm2, %v666_v62, -inf }
 0x493   :  { %673 = vmax.xlane.f32.xlu0 %v672_v0 }
 0x4a9   :  { %767 = vrot.lane.b32.xlu0 %v2159_v13, %s2026_s26 }
 0x4ad   :  { %843 = vrot.lane.b32.xlu0 %v2165_v15, %s2027_s27 }
 0x50c   :  { %v671_v1 = vpop.xlane.xlu1 %670 }
 0x50d   :  { %v675_v2 = vsub.f32 %v588_v54, %v671_v1 }
 0x50f   :  { %v677_v3 = vmul.f32 1.442695, %v675_v2 }
 0x511   :  { %1871 = vpow2.f32 %v677_v3 }
 0x51b   :  { %v1872_v4 = vpop.eup %1871 }
 0x51c   :  { %v681_v5 = vsel %vm185_vm2, %v1872_v4, 0.0 }
 0x51d   :  { %682 = vadd.xlane.f32.xlu1 %v681_v5 }
 0x520   :  { %v674_v6 = vpop.xlane.xlu0 %673 }
 0x521   :  { %v676_v9 = vsub.f32 %v666_v62, %v674_v6 }
 0x523   :  { %v679_v10 = vmul.f32 1.442695, %v676_v9 }
 0x524   :  { %v768_v7 = vpop.permute.xlu0 %767 }
 0x525   :  { %1769 = vmatpush3.msra.mxu1 %v768_v7  ;;  %1873 = vpow2.f32 %v679_v10 }
 0x526   :  { %1778 = vmatprep.subr.mxu1 %v2019_v8 }
 0x528   :  { %v844_v23 = vpop.permute.xlu0 %843 }
 0x52e   :  { %691 = vrot.lane.b32.xlu1 %v2156_v12, %s2026_s26 }
 0x52f   :  { %v1874_v11 = vpop.eup %1873 }
 0x530   :  { %v684_v14 = vsel %vm185_vm2, %v1874_v11, 0.0 }
 0x532   :  { %845 = vrot.lane.b32.xlu1 %v2156_v12, %s2028_s28 }
 0x536   :  { %923 = vrot.lane.b32.xlu1 %v2159_v13, %s2028_s28 }
 0x55a   :  { %685 = vadd.xlane.f32.xlu1 %v684_v14 }
 0x56b   :  { %921 = vrot.lane.b32.xlu1 %v2173_v17, %s2027_s27 }
 0x5aa   :  { %v683_v16 = vpop.xlane.xlu1 %682 }
 0x5ab   :  { %1875 = vrcp.f32 %v683_v16 }
 0x5ae   :  { %v692_v18 = vpop.permute.xlu1 %691 }
 0x5af   :  { %1764 = vmatpush3.msra.mxu0 %v692_v18 }
 0x5b0   :  { %1773 = vmatprep.subr.mxu0 %v2019_v8 }
 0x5b2   :  { %v846_v22 = vpop.permute.xlu1 %845 }
 0x5b5   :  { %v1876_v19 = vpop.eup %1875 }
 0x5b6   :  { %v689_v20 = vmul.f32 %v1876_v19, %v1872_v4  ;;  %v924_v24 = vpop.permute.xlu1 %923 }
 0x5b8   :  { %1766 = vmatmul.mubr.msk.f32.vlgmr.msra.gmra.mrb[4].mxu0 %vm185_vm2, %v689_v20 }
 0x5b9   :  { %1774 = vmatpush3.xpose.msk.msra.mxu0 %vm185_vm2, %v846_v22  ;;  %1775 = vmatprep.mubr.msk.f32.mxu0 %vm2020_vm1, %v2019_v8 }
 0x5ba   :  { %1783 = vmatprep.subr.mxu0 %v2019_v8 }
 0x5bc   :  { %1776 = vmatmul.mubr.msk.f32.vlgmr.msra.gmra.mrb[6].mxu0 %vm185_vm2, %v844_v23 }
 0x5bd   :  { %1785 = vmatprep.mubr.msk.f32.mxu0 %vm2020_vm1, %v2019_v8 }
 0x5e7   :  { %v686_v26 = vpop.xlane.xlu1 %685 }
 0x5e8   :  { %1877 = vrcp.f32 %v686_v26 }
 0x5eb   :  { %v922_v29 = vpop.permute.xlu1 %921 }
 0x5f2   :  { %v1878_v27 = vpop.eup %1877 }
 0x5f3   :  { %v690_v28 = vmul.f32 %v1878_v27, %v1874_v11 }
 0x5f5   :  { %1771 = vmatmul.mubr.msk.f32.vlgmr.msra.gmra.mrb[10].mxu1 %vm185_vm2, %v690_v28 }
 0x5f6   :  { %1779 = vmatpush3.xpose.msk.msra.mxu1 %vm185_vm2, %v924_v24  ;;  %1780 = vmatprep.mubr.msk.f32.mxu1 %vm2020_vm1, %v2019_v8 }
 0x5f7   :  { %1788 = vmatprep.subr.mxu1 %v2019_v8 }
 0x5f9   :  { %1781 = vmatmul.mubr.msk.f32.vlgmr.msra.gmra.mrb[12].mxu1 %vm185_vm2, %v922_v29 }
 0x5fa   :  { %1790 = vmatprep.mubr.msk.f32.mxu1 %vm2020_vm1, %v2019_v8 }
 0x68b   :  { %v2248_v30 = vpop.f32.mrb[4].mxu0 }
 0x68c   :  { %v1767_v31 = vpop.f32.mrb[5].mxu0 }
 0x68f   :  { %v917_v32 = vpop.f32.mrb[6].mxu0 }
 0x690   :  { %v918_v33 = vadd.f32 %v917_v32, %v2180_v21  ;;  %v1777_v34 = vpop.f32.mrb[7].mxu0 }
 0x691   :  { %v1536_v34 = vld [vmem:[#allocation8 + $0x8] sm:$0xff] }
 0x692   :  { %v999_v35 = vsel %vm185_vm2, %v918_v33, -inf }
 0x693   :  { %1000 = vmax.xlane.f32.xlu0 %v999_v35  ;;  %v1537_v35 = vld [vmem:[#allocation8 + $0x10] sm:$0xff] }
 0x6c8   :  { %v2252_v36 = vpop.f32.mrb[10].mxu1 }
 0x6c9   :  { %v1772_v37 = vpop.f32.mrb[11].mxu1 }
 0x6cc   :  { %v995_v38 = vpop.f32.mrb[12].mxu1 }
 0x6cd   :  { %v996_v39 = vadd.f32 %v995_v38, %v2183_v25  ;;  %v1782_v40 = vpop.f32.mrb[13].mxu1 }
 0x6cf   :  { %v1002_v41 = vsel %vm185_vm2, %v996_v39, -inf }
 0x6d0   :  { %1003 = vmax.xlane.f32.xlu1 %v1002_v41 }
 0x6e1   :  { %1021 = vrot.lane.b32.xlu1 %v2156_v12, %s2029_s29 }
 0x6e5   :  { %1175 = vrot.lane.b32.xlu1 %v2156_v12, %s2030_s30 }
 0x6e9   :  { %1253 = vrot.lane.b32.xlu1 %v2159_v13, %s2030_s30 }
 0x6ed   :  { %1251 = vrot.lane.b32.xlu1 %v2173_v17, %s2031_s7 }
 0x720   :  { %v1001_v42 = vpop.xlane.xlu0 %1000 }
 0x721   :  { %v1005_v43 = vsub.f32 %v918_v33, %v1001_v42  ;;  %v1535_v33 = vld [vmem:[#allocation8] sm:$0xff] }
 0x723   :  { %v1007_v44 = vmul.f32 1.442695, %v1005_v43 }
 0x725   :  { %1879 = vpow2.f32 %v1007_v44 }
 0x72f   :  { %v1880_v45 = vpop.eup %1879 }
 0x730   :  { %v1011_v46 = vsel %vm185_vm2, %v1880_v45, 0.0 }
 0x731   :  { %1012 = vadd.xlane.f32.xlu0 %v1011_v46 }
 0x747   :  { %1097 = vrot.lane.b32.xlu0 %v2159_v13, %s2029_s29 }
 0x75d   :  { %v1004_v47 = vpop.xlane.xlu1 %1003 }
 0x75e   :  { %v1006_v48 = vsub.f32 %v996_v39, %v1004_v47 }
 0x760   :  { %v1009_v49 = vmul.f32 1.442695, %v1006_v48 }
 0x761   :  { %v1022_v50 = vpop.permute.xlu1 %1021 }
 0x762   :  { %1881 = vpow2.f32 %v1009_v49  ;;  %1784 = vmatpush3.msra.mxu0 %v1022_v50 }
 0x763   :  { %1793 = vmatprep.subr.mxu0 %v2019_v8 }
 0x765   :  { %v1176_v56 = vpop.permute.xlu1 %1175 }
 0x769   :  { %v1254_v61 = vpop.permute.xlu1 %1253 }
 0x76c   :  { %v1882_v51 = vpop.eup %1881 }
 0x76d   :  { %v1014_v17 = vsel %vm185_vm2, %v1882_v51, 0.0  ;;  %v1252_v63 = vpop.permute.xlu1 %1251 }
 0x76e   :  { %1015 = vadd.xlane.f32.xlu0 %v1014_v17 }
 0x784   :  { %1173 = vrot.lane.b32.xlu0 %v2165_v15, %s2031_s7 }
 0x7be   :  { %v1013_v52 = vpop.xlane.xlu0 %1012 }
 0x7bf   :  { %1883 = vrcp.f32 %v1013_v52 }
 0x7c2   :  { %v1098_v53 = vpop.permute.xlu0 %1097 }
 0x7c3   :  { %1789 = vmatpush3.msra.mxu1 %v1098_v53 }
 0x7c4   :  { %1798 = vmatprep.subr.mxu1 %v2019_v8 }
 0x7c9   :  { %v1884_v54 = vpop.eup %1883 }
 0x7ca   :  { %v1019_v55 = vmul.f32 %v1884_v54, %v1880_v45 }
 0x7cc   :  { %1786 = vmatmul.mubr.msk.f32.vlgmr.msra.gmra.mrb[8].mxu0 %vm185_vm2, %v1019_v55 }
 0x7cd   :  { %1794 = vmatpush3.xpose.msk.msra.mxu0 %vm185_vm2, %v1176_v56  ;;  %1795 = vmatprep.mubr.msk.f32.mxu0 %vm2020_vm1, %v2019_v8 }
 0x7ce   :  { %1803 = vmatprep.subr.mxu0 %v2019_v8 }
 0x7fb   :  { %v1016_v58 = vpop.xlane.xlu0 %1015 }
 0x7fc   :  { %1885 = vrcp.f32 %v1016_v58 }
 0x7ff   :  { %v1174_v15 = vpop.permute.xlu0 %1173 }
 0x800   :  { %1796 = vmatmul.mubr.msk.f32.vlgmr.msra.gmra.mrb[10].mxu0 %vm185_vm2, %v1174_v15 }
 0x801   :  { %1805 = vmatprep.mubr.msk.f32.mxu0 %vm2020_vm1, %v2019_v8 }
 0x806   :  { %v1886_v60 = vpop.eup %1885 }
 0x807   :  { %v1020_v62 = vmul.f32 %v1886_v60, %v1882_v51 }
 0x809   :  { %1791 = vmatmul.mubr.msk.f32.vlgmr.msra.gmra.mrb[14].mxu1 %vm185_vm2, %v1020_v62 }
 0x80a   :  { %1799 = vmatpush3.xpose.msk.msra.mxu1 %vm185_vm2, %v1254_v61  ;;  %1800 = vmatprep.mubr.msk.f32.mxu1 %vm2020_vm1, %v2019_v8 }
 0x80b   :  { %1808 = vmatprep.subr.mxu1 %v2019_v8 }
 0x80d   :  { %1801 = vmatmul.mubr.msk.f32.vlgmr.msra.gmra.mrb[16].mxu1 %vm185_vm2, %v1252_v63 }
 0x80e   :  { %1810 = vmatprep.mubr.msk.f32.mxu1 %vm2020_vm1, %v2019_v8 }
 0x89f   :  { %v1093_v0 = vpop.f32.mrb[8].mxu0 }
 0x8a0   :  { %v1787_v1 = vpop.f32.mrb[9].mxu0 }
 0x8d3   :  { %v1247_v2 = vpop.f32.mrb[10].mxu0 }
 0x8d4   :  { %v1248_v3 = vadd.f32 %v1247_v2, %v2180_v21  ;;  %v1797_v4 = vpop.f32.mrb[11].mxu0 }
 0x8d6   :  { %v1329_v5 = vsel %vm185_vm2, %v1248_v3, -inf }
 0x8d7   :  { %1330 = vmax.xlane.f32.xlu0 %v1329_v5 }
 0x8dc   :  { %v1169_v6 = vpop.f32.mrb[14].mxu1 }
 0x8dd   :  { %v1792_v7 = vpop.f32.mrb[15].mxu1 }
 0x8e0   :  { %v1325_v9 = vpop.f32.mrb[16].mxu1 }
 0x8e1   :  { %v1326_v10 = vadd.f32 %v1325_v9, %v2183_v25  ;;  %v1802_v11 = vpop.f32.mrb[17].mxu1 }
 0x8e3   :  { %v1332_v14 = vsel %vm185_vm2, %v1326_v10, -inf }
 0x8e4   :  { %1333 = vmax.xlane.f32.xlu1 %v1332_v14 }
 0x8f5   :  { %1351 = vrot.lane.b32.xlu1 %v2156_v12, %s2032_s8 }
 0x8f9   :  { %1505 = vrot.lane.b32.xlu1 %v2248_v30, %s2016_s10 }
 0x8fd   :  { %1507 = vrot.lane.b32.xlu1 %v2252_v36, %s2016_s10  ;;  %v1832_v36 = vpack.c.bf16 %v1536_v34, %v1535_v33 }
 0x901   :  { %1515 = vrot.lane.b32.xlu1 %v1169_v6, %s2033_s11 }
 0x964   :  { %v1331_v8 = vpop.xlane.xlu0 %1330 }
 0x965   :  { %v1335_v21 = vsub.f32 %v1248_v3, %v1331_v8 }
 0x967   :  { %v1337_v16 = vmul.f32 1.442695, %v1335_v21 }
 0x969   :  { %1887 = vpow2.f32 %v1337_v16 }
 0x971   :  { %v1334_v25 = vpop.xlane.xlu1 %1333 }
 0x972   :  { %v1336_v18 = vsub.f32 %v1326_v10, %v1334_v25 }
 0x973   :  { %v1888_v19 = vpop.eup %1887 }
 0x974   :  { %v1339_v20 = vmul.f32 1.442695, %v1336_v18  ;;  %v1341_v22 = vsel %vm185_vm2, %v1888_v19, 0.0 }
 0x975   :  { %1342 = vadd.xlane.f32.xlu0 %v1341_v22  ;;  %v1352_v12 = vpop.permute.xlu1 %1351 }
 0x976   :  { %1889 = vpow2.f32 %v1339_v20  ;;  %1804 = vmatpush3.msra.mxu0 %v1352_v12 }
 0x977   :  { %1833 = vmatprep.subr.bf16.mxu0 %v1832_v36 }
 0x979   :  { %v1506_v42 = vpop.permute.xlu1 %1505 }
 0x97a   :  { %v1527_v44 = vsel %vm185_vm2, %v2216_v57, %v1506_v42  ;;  %v1675_v57 = vld [vmem:[%s2327_s5] ss:$0 sm:$0xff] }
 0x97d   :  { %v1508_v48 = vpop.permute.xlu1 %1507 }
 0x97e   :  { %v1528_v50 = vsel %vm185_vm2, %v2218_v59, %v1508_v48 }
 0x980   :  { %v1890_v23 = vpop.eup %1889 }
 0x981   :  { %v1344_v24 = vsel %vm185_vm2, %v1890_v23, 0.0  ;;  %v1516_v49 = vpop.permute.xlu1 %1515 }
 0x982   :  { %1345 = vadd.xlane.f32.xlu0 %v1344_v24  ;;  %v1531_v51 = vsel %vm1529_vm6, %v1528_v50, %v1516_v49 }
 0x998   :  { %1427 = vrot.lane.b32.xlu0 %v2159_v13, %s2032_s8  ;;  %v1538_v13 = vld [vmem:[#allocation8 + $0x18] sm:$0xff] }
 0x999   :  { %v1836_v37 = vpack.c.bf16 %v1538_v13, %v1537_v35 }
 0x99c   :  { %1513 = vrot.lane.b32.xlu0 %v1093_v0, %s2033_s11 }
 0xa02   :  { %v1343_v26 = vpop.xlane.xlu0 %1342 }
 0xa03   :  { %1891 = vrcp.f32 %v1343_v26 }
 0xa0d   :  { %v1892_v27 = vpop.eup %1891 }
 0xa0e   :  { %v1349_v28 = vmul.f32 %v1892_v27, %v1888_v19 }
 0xa0f   :  { %v1346_v29 = vpop.xlane.xlu0 %1345 }
 0xa10   :  { %1893 = vrcp.f32 %v1346_v29  ;;  %1806 = vmatmul.mubr.msk.f32.vlgmr.msra.gmra.mrb[12].mxu0 %vm185_vm2, %v1349_v28 }
 0xa11   :  { %1835 = vmatpush3.bf16.msra.mxu0 %v1832_v36 }
 0xa12   :  { %1837 = vmatprep.subr.bf16.mxu0 %v1836_v37 }
 0xa13   :  { %v1428_v30 = vpop.permute.xlu0 %1427 }
 0xa14   :  { %1809 = vmatpush3.msra.mxu1 %v1428_v30 }
 0xa15   :  { %1839 = vmatpush3.bf16.msra.mxu0 %v1836_v37 }
 0xa17   :  { %v1514_v43 = vpop.permute.xlu0 %1513 }
 0xa18   :  { %v1530_v45 = vsel %vm1529_vm6, %v1527_v44, %v1514_v43 }
 0xa1a   :  { %v1894_v31 = vpop.eup %1893 }
 0xa1b   :  { %v1350_v32 = vmul.f32 %v1894_v31, %v1890_v23 }
 0xa1d   :  { %1811 = vmatmul.mubr.msk.f32.vlgmr.msra.gmra.mrb[18].mxu1 %vm185_vm2, %v1350_v32 }
 0xae3   :  { %v1423_v38 = vpop.f32.mrb[12].mxu0 }
 0xae4   :  { %1521 = vrot.lane.b32.xlu0 %v1423_v38, %s2034_s0  ;;  %v1807_v39 = vpop.f32.mrb[13].mxu0 }
 0xaf0   :  { %v1499_v40 = vpop.f32.mrb[18].mxu1 }
 0xaf1   :  { %1523 = vrot.lane.b32.xlu1 %v1499_v40, %s2034_s0  ;;  %v1812_v41 = vpop.f32.mrb[19].mxu1 }
 0xb56   :  { %v1522_v46 = vpop.permute.xlu0 %1521 }
 0xb57   :  { %v1533_v47 = vsel %vm1532_vm5, %v1530_v45, %v1522_v46 }
 0xb58   :  { %1821 = vmatprep.mubr.msk.f32.mxu0 %vm92_vm0, %v1533_v47 }
 0xb63   :  { %v1524_v17 = vpop.permute.xlu1 %1523 }
 0xb64   :  { %v1534_v52 = vsel %vm1532_vm5, %v1531_v51, %v1524_v17 }
 0xb65   :  { %1822 = vmatmul.mubr.msk.f32.vlgmr.msra.gmra.mrb[14].mxu0 %vm92_vm0, %v1534_v52 }
 0xc38   :  { %v1823_v53 = vpop.f32.mrb[14].mxu0 }
 0xc39   :  { %v1624_v54 = vadd.f32 %v1823_v53, %v1675_v57  ;;  %v1618_v55 = vpop.f32.mrb[15].mxu0 }
 0xc3a   :  { %v1619_v56 = vadd.f32 %v1675_v57, %v1618_v55 }
 0xc3b   :  { %1628 = vst.msk [vmem:[#allocation10 + $0x8] sm:$0xff] %vm92_vm0, %v1624_v54 }
 0xc3c   :  { %1627 = vst.msk [vmem:[#allocation10] sm:$0xff] %vm92_vm0, %v1619_v56 }
 0xc3d   :  { %1994 = shalt.err (!%p1991_p8)
}
 0xc3e   :  { %s1995_s17 = scalar_lea.hbm %s2328_s6, 256 }
 0xc3f   :  { %p1996_p9 = scmp.ne.s32.totalorder %s2328_s6, %s1995_s17  ;;  %p1999_p10 = scmp.lt.u32.totalorder %s1995_s17, %s2328_s6 }
 0xc41   :  { %p2001_p11 = pnand %p1999_p10, %p1996_p9 }
 0xc43   :  { %2004 = shalt.err (!%p2001_p11)
}
 0xc44   :  { %1640 = dma.vmem_to_hbm [thread:$0]  %s1635_s14, 256, %s2328_s6, [#allocation4], %s2015_s9, %s2015_s9, %s2016_s10  }
 0xc45   :  { %2011 = dma.done.wait [#allocation4], 256  }
 0xc46   :  { %2012 = vsyncadd [#allocation4], 4294967040 }
 0xc47   :  { %1644 = vsyncpa [#allocation3], 1 }
 0xc48   :  { %1645 = vsyncpa [#allocation6], 1 }
 0xc49   :  { %1646 = vsyncpa [#allocation9], 1 }
 0xc4a   :  { %1647 = vsyncpa [#allocation4], 1 }

</bundles_post_ra>
